<compile_context>
chip_gen: v6e
topology: v6e:2x2x1
jax: 0.10.0
libtpu: 0.0.40
codegen_flags: <defaults>
</compile_context>

<pallas_src>
import functools

import jax
import jax.numpy as jnp
from jax.experimental import pallas as pl
from jax.experimental.pallas import tpu as pltpu


def _spectral_mix_kernel(xr_ref, xi_ref, wr_ref, wi_ref, or_ref, oi_ref):
    """out[b, o, m] = sum_i x[b, i, m] * w[i, o, m]   (complex, per lane m)."""
    xr = xr_ref[...]                       # (B, Cin, TM)  float32
    xi = xi_ref[...]
    wr = wr_ref[...]                       # (Cin, Cout, TM) float32
    wi = wi_ref[...]

    B, Cin, TM = xr.shape
    Cout = wr.shape[1]

    acc_r = jnp.zeros((B, Cout, TM), jnp.float32)
    acc_i = jnp.zeros((B, Cout, TM), jnp.float32)

    # Statically unrolled over Cin; live set stays at a few (B, Cout, TM) tiles.
    # Standard 4-mul / 4-add complex MAC: on TPU mul and add share the same
    # VALU slot, so the 3-mul (Karatsuba) form is strictly MORE ops -- dropped.
    for i in range(Cin):
        xr_i = xr[:, i, :][:, None, :]     # (B, 1, TM)
        xi_i = xi[:, i, :][:, None, :]
        wr_i = wr[i][None, :, :]           # (1, Cout, TM)
        wi_i = wi[i][None, :, :]
        acc_r = acc_r + (xr_i * wr_i - xi_i * wi_i)
        acc_i = acc_i + (xr_i * wi_i + xi_i * wr_i)

    or_ref[...] = acc_r
    oi_ref[...] = acc_i


def _spectral_mix_pallas(x_modes, w_modes):
    """Fused complex contraction out[b,o,m] = sum_i x[b,i,m] * w[i,o,m].

    x_modes: (B, Cin, Mtot)   complex64   (both bands concatenated on m)
    w_modes: (Cin, Cout, Mtot) complex64
    returns: (B, Cout, Mtot)  complex64
    """
    B, Cin, Mtot = x_modes.shape
    Cout = w_modes.shape[1]
    Mp = max(128, ((Mtot + 127) // 128) * 128)     # lane axis padded to 128k

    def split_pad(a):
        pad = [(0, 0)] * (a.ndim - 1) + [(0, Mp - Mtot)]
        ar = jnp.pad(jnp.real(a), pad).astype(jnp.float32)
        ai = jnp.pad(jnp.imag(a), pad).astype(jnp.float32)
        return ar, ai

    xr, xi = split_pad(x_modes)                    # (B, Cin, Mp)
    wr, wi = split_pad(w_modes)                    # (Cin, Cout, Mp)

    # Lane tile: largest multiple of 128 dividing Mp whose double-buffered
    # per-step footprint stays well inside the default scoped-VMEM limit.
    per_lane_bytes = 4 * 2 * (B * Cin + Cin * Cout + B * Cout) * 2  # f32, re+im, 2 bufs
    budget = 8 << 20
    TM = 128
    for cand in (Mp, 4096, 2048, 1024, 512, 256, 128):
        if cand <= Mp and Mp % cand == 0 and cand * per_lane_bytes <= budget:
            TM = cand
            break
    grid = (Mp // TM,)

    cost = pl.CostEstimate(
        flops=8 * B * Cin * Cout * Mtot,
        transcendentals=0,
        bytes_accessed=4 * 2 * Mp * (B * Cin + Cin * Cout + B * Cout),
    )

    out_r, out_i = pl.pallas_call(
        _spectral_mix_kernel,
        out_shape=(
            jax.ShapeDtypeStruct((B, Cout, Mp), jnp.float32),
            jax.ShapeDtypeStruct((B, Cout, Mp), jnp.float32),
        ),
        grid=grid,
        in_specs=[
            pl.BlockSpec((B, Cin, TM), lambda m: (0, 0, m)),
            pl.BlockSpec((B, Cin, TM), lambda m: (0, 0, m)),
            pl.BlockSpec((Cin, Cout, TM), lambda m: (0, 0, m)),
            pl.BlockSpec((Cin, Cout, TM), lambda m: (0, 0, m)),
        ],
        out_specs=(
            pl.BlockSpec((B, Cout, TM), lambda m: (0, 0, m)),
            pl.BlockSpec((B, Cout, TM), lambda m: (0, 0, m)),
        ),
        compiler_params=pltpu.CompilerParams(
            # Every lane tile is independent work -> shardable across cores.
            dimension_semantics=("parallel",),
        ),
        cost_estimate=cost,
    )(xr, xi, wr, wi)

    return (out_r[..., :Mtot] + 1j * out_i[..., :Mtot]).astype(jnp.complex64)


def spectral_conv2d(x, weights1, weights2, modes1, modes2):
    """Forward pass of SpectralConv2d.

    x:        (B, Cin, H, W)  float32   (NCHW, matching the PyTorch module)
    weights1: (Cin, Cout, modes1, modes2) complex64
    weights2: (Cin, Cout, modes1, modes2) complex64
    returns:  (B, Cout, H, W) float32
    """
    B, Cin, H, W = x.shape
    Cout = weights1.shape[1]
    M = modes1 * modes2

    # TODO(synk): FFT has no Pallas primitive; rfftn / irfft2 stay in plain JAX.
    x_ft = jnp.fft.rfftn(x, axes=(-2, -1))               # (B, Cin, H, W//2+1)

    low = x_ft[:, :, :modes1, :modes2].reshape(B, Cin, M)
    high = x_ft[:, :, H - modes1:, :modes2].reshape(B, Cin, M)
    x_modes = jnp.concatenate([low, high], axis=-1)      # (B, Cin, 2M)

    w_modes = jnp.concatenate(
        [weights1.reshape(Cin, Cout, M), weights2.reshape(Cin, Cout, M)],
        axis=-1)                                         # (Cin, Cout, 2M)

    out_modes = _spectral_mix_pallas(x_modes, w_modes)   # (B, Cout, 2M)
    out_low = out_modes[..., :M].reshape(B, Cout, modes1, modes2)
    out_high = out_modes[..., M:].reshape(B, Cout, modes1, modes2)

    out_ft = jnp.zeros((B, Cout, H, W // 2 + 1), dtype=jnp.complex64)
    out_ft = out_ft.at[:, :, :modes1, :modes2].set(out_low)
    out_ft = out_ft.at[:, :, H - modes1:, :modes2].set(out_high)

    x_out = jnp.fft.irfft2(out_ft, s=(H, W), axes=(-2, -1))
    return x_out.astype(jnp.float32)


def _reference(x, weights1, weights2, modes1, modes2):
    """Pure-jnp reference mirroring the PyTorch forward, for a sanity check."""
    B, Cin, H, W = x.shape
    Cout = weights1.shape[1]
    x_ft = jnp.fft.rfftn(x, axes=(-2, -1))
    out_ft = jnp.zeros((B, Cout, H, W // 2 + 1), dtype=jnp.complex64)
    out_ft = out_ft.at[:, :, :modes1, :modes2].set(
        jnp.einsum('bixy,ioxy->boxy', x_ft[:, :, :modes1, :modes2], weights1))
    out_ft = out_ft.at[:, :, H - modes1:, :modes2].set(
        jnp.einsum('bixy,ioxy->boxy', x_ft[:, :, H - modes1:, :modes2], weights2))
    return jnp.fft.irfft2(out_ft, s=(H, W), axes=(-2, -1)).astype(jnp.float32)


if __name__ == "__main__":
    # Small shapes consistent with the module: batch=2, in/out channels=4,
    # spatial=16x16, modes1=modes2=4.
    B, Cin, Cout, H, W = 2, 4, 4, 16, 16
    modes1, modes2 = 4, 4
    scale = 1.0 / (Cin * Cout)

    key = jax.random.PRNGKey(0)
    kx, kw1r, kw1i, kw2r, kw2i = jax.random.split(key, 5)

    x = jax.random.normal(kx, (B, Cin, H, W), dtype=jnp.float32)

    # torch.rand(..., dtype=cfloat) samples real & imag parts uniform in [0,1).
    w1 = (scale * (jax.random.uniform(kw1r, (Cin, Cout, modes1, modes2))
                   + 1j * jax.random.uniform(kw1i, (Cin, Cout, modes1, modes2)))
          ).astype(jnp.complex64)
    w2 = (scale * (jax.random.uniform(kw2r, (Cin, Cout, modes1, modes2))
                   + 1j * jax.random.uniform(kw2i, (Cin, Cout, modes1, modes2)))
          ).astype(jnp.complex64)

    fwd = jax.jit(functools.partial(spectral_conv2d, modes1=modes1, modes2=modes2))
    out = jax.block_until_ready(fwd(x, w1, w2))

    ref = jax.block_until_ready(_reference(x, w1, w2, modes1, modes2))
    assert out.shape == (B, Cout, H, W)
    assert jnp.allclose(out, ref, atol=1e-4, rtol=1e-4)

    print("KERNEL_OK")
</pallas_src>

<mosaic_0001>
module attributes {stable_mosaic.version = 11 : i64} {
  func.func @_spectral_mix_kernel(%arg0: i32, %arg1: memref<2x4x128xf32, #tpu.memory_space<vmem>>, %arg2: memref<2x4x128xf32, #tpu.memory_space<vmem>>, %arg3: memref<4x4x128xf32, #tpu.memory_space<vmem>>, %arg4: memref<4x4x128xf32, #tpu.memory_space<vmem>>, %arg5: memref<2x4x128xf32, #tpu.memory_space<vmem>>, %arg6: memref<2x4x128xf32, #tpu.memory_space<vmem>>) attributes {dimension_semantics = [#tpu.dimension_semantics<parallel>], iteration_bounds = array<i64: 1>, scalar_prefetch = 0 : i64, scratch_operands = 0 : i64, tpu.core_type = #tpu.core_type<tc>, window_params = [{transform_indices = @transform_0, window_bounds = array<i64: 2, 4, 128>}, {transform_indices = @transform_1, window_bounds = array<i64: 2, 4, 128>}, {transform_indices = @transform_2, window_bounds = array<i64: 4, 4, 128>}, {transform_indices = @transform_3, window_bounds = array<i64: 4, 4, 128>}, {transform_indices = @transform_4, window_bounds = array<i64: 2, 4, 128>}, {transform_indices = @transform_5, window_bounds = array<i64: 2, 4, 128>}]} {
    %c0 = arith.constant 0 : index
    %c0_0 = arith.constant 0 : index
    %c0_1 = arith.constant 0 : index
    %0 = vector.load %arg1[%c0, %c0_0, %c0_1] : memref<2x4x128xf32, #tpu.memory_space<vmem>>, vector<2x4x128xf32>
    %c0_2 = arith.constant 0 : index
    %c0_3 = arith.constant 0 : index
    %c0_4 = arith.constant 0 : index
    %1 = vector.load %arg2[%c0_2, %c0_3, %c0_4] : memref<2x4x128xf32, #tpu.memory_space<vmem>>, vector<2x4x128xf32>
    %c0_5 = arith.constant 0 : index
    %c0_6 = arith.constant 0 : index
    %c0_7 = arith.constant 0 : index
    %2 = vector.load %arg3[%c0_5, %c0_6, %c0_7] : memref<4x4x128xf32, #tpu.memory_space<vmem>>, vector<4x4x128xf32>
    %c0_8 = arith.constant 0 : index
    %c0_9 = arith.constant 0 : index
    %c0_10 = arith.constant 0 : index
    %3 = vector.load %arg4[%c0_8, %c0_9, %c0_10] : memref<4x4x128xf32, #tpu.memory_space<vmem>>, vector<4x4x128xf32>
    %cst = arith.constant 0.000000e+00 : f32
    %4 = vector.broadcast %cst : f32 to vector<2x4x128xf32>
    %cst_11 = arith.constant 0.000000e+00 : f32
    %5 = vector.broadcast %cst_11 : f32 to vector<2x4x128xf32>
    %6 = vector.extract_strided_slice %0 {offsets = [0, 0, 0], sizes = [2, 1, 128], strides = [1, 1, 1]} : vector<2x4x128xf32> to vector<2x1x128xf32>
    %7 = vector.shape_cast %6 : vector<2x1x128xf32> to vector<2x128xf32>
    %8 = vector.shape_cast %7 : vector<2x128xf32> to vector<2x1x128xf32>
    %9 = vector.extract_strided_slice %1 {offsets = [0, 0, 0], sizes = [2, 1, 128], strides = [1, 1, 1]} : vector<2x4x128xf32> to vector<2x1x128xf32>
    %10 = vector.shape_cast %9 : vector<2x1x128xf32> to vector<2x128xf32>
    %11 = vector.shape_cast %10 : vector<2x128xf32> to vector<2x1x128xf32>
    %12 = vector.extract_strided_slice %2 {offsets = [0, 0, 0], sizes = [1, 4, 128], strides = [1, 1, 1]} : vector<4x4x128xf32> to vector<1x4x128xf32>
    %13 = vector.shape_cast %12 : vector<1x4x128xf32> to vector<4x128xf32>
    %14 = vector.shape_cast %13 : vector<4x128xf32> to vector<1x4x128xf32>
    %15 = vector.extract_strided_slice %3 {offsets = [0, 0, 0], sizes = [1, 4, 128], strides = [1, 1, 1]} : vector<4x4x128xf32> to vector<1x4x128xf32>
    %16 = vector.shape_cast %15 : vector<1x4x128xf32> to vector<4x128xf32>
    %17 = vector.shape_cast %16 : vector<4x128xf32> to vector<1x4x128xf32>
    %18 = vector.broadcast %8 : vector<2x1x128xf32> to vector<2x4x128xf32>
    %19 = vector.broadcast %14 : vector<1x4x128xf32> to vector<2x4x128xf32>
    %20 = arith.mulf %18, %19 : vector<2x4x128xf32>
    %21 = vector.broadcast %11 : vector<2x1x128xf32> to vector<2x4x128xf32>
    %22 = vector.broadcast %17 : vector<1x4x128xf32> to vector<2x4x128xf32>
    %23 = arith.mulf %21, %22 : vector<2x4x128xf32>
    %24 = arith.subf %20, %23 : vector<2x4x128xf32>
    %25 = arith.addf %4, %24 : vector<2x4x128xf32>
    %26 = vector.broadcast %8 : vector<2x1x128xf32> to vector<2x4x128xf32>
    %27 = vector.broadcast %17 : vector<1x4x128xf32> to vector<2x4x128xf32>
    %28 = arith.mulf %26, %27 : vector<2x4x128xf32>
    %29 = vector.broadcast %11 : vector<2x1x128xf32> to vector<2x4x128xf32>
    %30 = vector.broadcast %14 : vector<1x4x128xf32> to vector<2x4x128xf32>
    %31 = arith.mulf %29, %30 : vector<2x4x128xf32>
    %32 = arith.addf %28, %31 : vector<2x4x128xf32>
    %33 = arith.addf %5, %32 : vector<2x4x128xf32>
    %34 = vector.extract_strided_slice %0 {offsets = [0, 1, 0], sizes = [2, 1, 128], strides = [1, 1, 1]} : vector<2x4x128xf32> to vector<2x1x128xf32>
    %35 = vector.shape_cast %34 : vector<2x1x128xf32> to vector<2x128xf32>
    %36 = vector.shape_cast %35 : vector<2x128xf32> to vector<2x1x128xf32>
    %37 = vector.extract_strided_slice %1 {offsets = [0, 1, 0], sizes = [2, 1, 128], strides = [1, 1, 1]} : vector<2x4x128xf32> to vector<2x1x128xf32>
    %38 = vector.shape_cast %37 : vector<2x1x128xf32> to vector<2x128xf32>
    %39 = vector.shape_cast %38 : vector<2x128xf32> to vector<2x1x128xf32>
    %40 = vector.extract_strided_slice %2 {offsets = [1, 0, 0], sizes = [1, 4, 128], strides = [1, 1, 1]} : vector<4x4x128xf32> to vector<1x4x128xf32>
    %41 = vector.shape_cast %40 : vector<1x4x128xf32> to vector<4x128xf32>
    %42 = vector.shape_cast %41 : vector<4x128xf32> to vector<1x4x128xf32>
    %43 = vector.extract_strided_slice %3 {offsets = [1, 0, 0], sizes = [1, 4, 128], strides = [1, 1, 1]} : vector<4x4x128xf32> to vector<1x4x128xf32>
    %44 = vector.shape_cast %43 : vector<1x4x128xf32> to vector<4x128xf32>
    %45 = vector.shape_cast %44 : vector<4x128xf32> to vector<1x4x128xf32>
    %46 = vector.broadcast %36 : vector<2x1x128xf32> to vector<2x4x128xf32>
    %47 = vector.broadcast %42 : vector<1x4x128xf32> to vector<2x4x128xf32>
    %48 = arith.mulf %46, %47 : vector<2x4x128xf32>
    %49 = vector.broadcast %39 : vector<2x1x128xf32> to vector<2x4x128xf32>
    %50 = vector.broadcast %45 : vector<1x4x128xf32> to vector<2x4x128xf32>
    %51 = arith.mulf %49, %50 : vector<2x4x128xf32>
    %52 = arith.subf %48, %51 : vector<2x4x128xf32>
    %53 = arith.addf %25, %52 : vector<2x4x128xf32>
    %54 = vector.broadcast %36 : vector<2x1x128xf32> to vector<2x4x128xf32>
    %55 = vector.broadcast %45 : vector<1x4x128xf32> to vector<2x4x128xf32>
    %56 = arith.mulf %54, %55 : vector<2x4x128xf32>
    %57 = vector.broadcast %39 : vector<2x1x128xf32> to vector<2x4x128xf32>
    %58 = vector.broadcast %42 : vector<1x4x128xf32> to vector<2x4x128xf32>
    %59 = arith.mulf %57, %58 : vector<2x4x128xf32>
    %60 = arith.addf %56, %59 : vector<2x4x128xf32>
    %61 = arith.addf %33, %60 : vector<2x4x128xf32>
    %62 = vector.extract_strided_slice %0 {offsets = [0, 2, 0], sizes = [2, 1, 128], strides = [1, 1, 1]} : vector<2x4x128xf32> to vector<2x1x128xf32>
    %63 = vector.shape_cast %62 : vector<2x1x128xf32> to vector<2x128xf32>
    %64 = vector.shape_cast %63 : vector<2x128xf32> to vector<2x1x128xf32>
    %65 = vector.extract_strided_slice %1 {offsets = [0, 2, 0], sizes = [2, 1, 128], strides = [1, 1, 1]} : vector<2x4x128xf32> to vector<2x1x128xf32>
    %66 = vector.shape_cast %65 : vector<2x1x128xf32> to vector<2x128xf32>
    %67 = vector.shape_cast %66 : vector<2x128xf32> to vector<2x1x128xf32>
    %68 = vector.extract_strided_slice %2 {offsets = [2, 0, 0], sizes = [1, 4, 128], strides = [1, 1, 1]} : vector<4x4x128xf32> to vector<1x4x128xf32>
    %69 = vector.shape_cast %68 : vector<1x4x128xf32> to vector<4x128xf32>
    %70 = vector.shape_cast %69 : vector<4x128xf32> to vector<1x4x128xf32>
    %71 = vector.extract_strided_slice %3 {offsets = [2, 0, 0], sizes = [1, 4, 128], strides = [1, 1, 1]} : vector<4x4x128xf32> to vector<1x4x128xf32>
    %72 = vector.shape_cast %71 : vector<1x4x128xf32> to vector<4x128xf32>
    %73 = vector.shape_cast %72 : vector<4x128xf32> to vector<1x4x128xf32>
    %74 = vector.broadcast %64 : vector<2x1x128xf32> to vector<2x4x128xf32>
    %75 = vector.broadcast %70 : vector<1x4x128xf32> to vector<2x4x128xf32>
    %76 = arith.mulf %74, %75 : vector<2x4x128xf32>
    %77 = vector.broadcast %67 : vector<2x1x128xf32> to vector<2x4x128xf32>
    %78 = vector.broadcast %73 : vector<1x4x128xf32> to vector<2x4x128xf32>
    %79 = arith.mulf %77, %78 : vector<2x4x128xf32>
    %80 = arith.subf %76, %79 : vector<2x4x128xf32>
    %81 = arith.addf %53, %80 : vector<2x4x128xf32>
    %82 = vector.broadcast %64 : vector<2x1x128xf32> to vector<2x4x128xf32>
    %83 = vector.broadcast %73 : vector<1x4x128xf32> to vector<2x4x128xf32>
    %84 = arith.mulf %82, %83 : vector<2x4x128xf32>
    %85 = vector.broadcast %67 : vector<2x1x128xf32> to vector<2x4x128xf32>
    %86 = vector.broadcast %70 : vector<1x4x128xf32> to vector<2x4x128xf32>
    %87 = arith.mulf %85, %86 : vector<2x4x128xf32>
    %88 = arith.addf %84, %87 : vector<2x4x128xf32>
    %89 = arith.addf %61, %88 : vector<2x4x128xf32>
    %90 = vector.extract_strided_slice %0 {offsets = [0, 3, 0], sizes = [2, 1, 128], strides = [1, 1, 1]} : vector<2x4x128xf32> to vector<2x1x128xf32>
    %91 = vector.shape_cast %90 : vector<2x1x128xf32> to vector<2x128xf32>
    %92 = vector.shape_cast %91 : vector<2x128xf32> to vector<2x1x128xf32>
    %93 = vector.extract_strided_slice %1 {offsets = [0, 3, 0], sizes = [2, 1, 128], strides = [1, 1, 1]} : vector<2x4x128xf32> to vector<2x1x128xf32>
    %94 = vector.shape_cast %93 : vector<2x1x128xf32> to vector<2x128xf32>
    %95 = vector.shape_cast %94 : vector<2x128xf32> to vector<2x1x128xf32>
    %96 = vector.extract_strided_slice %2 {offsets = [3, 0, 0], sizes = [1, 4, 128], strides = [1, 1, 1]} : vector<4x4x128xf32> to vector<1x4x128xf32>
    %97 = vector.shape_cast %96 : vector<1x4x128xf32> to vector<4x128xf32>
    %98 = vector.shape_cast %97 : vector<4x128xf32> to vector<1x4x128xf32>
    %99 = vector.extract_strided_slice %3 {offsets = [3, 0, 0], sizes = [1, 4, 128], strides = [1, 1, 1]} : vector<4x4x128xf32> to vector<1x4x128xf32>
    %100 = vector.shape_cast %99 : vector<1x4x128xf32> to vector<4x128xf32>
    %101 = vector.shape_cast %100 : vector<4x128xf32> to vector<1x4x128xf32>
    %102 = vector.broadcast %92 : vector<2x1x128xf32> to vector<2x4x128xf32>
    %103 = vector.broadcast %98 : vector<1x4x128xf32> to vector<2x4x128xf32>
    %104 = arith.mulf %102, %103 : vector<2x4x128xf32>
    %105 = vector.broadcast %95 : vector<2x1x128xf32> to vector<2x4x128xf32>
    %106 = vector.broadcast %101 : vector<1x4x128xf32> to vector<2x4x128xf32>
    %107 = arith.mulf %105, %106 : vector<2x4x128xf32>
    %108 = arith.subf %104, %107 : vector<2x4x128xf32>
    %109 = arith.addf %81, %108 : vector<2x4x128xf32>
    %110 = vector.broadcast %92 : vector<2x1x128xf32> to vector<2x4x128xf32>
    %111 = vector.broadcast %101 : vector<1x4x128xf32> to vector<2x4x128xf32>
    %112 = arith.mulf %110, %111 : vector<2x4x128xf32>
    %113 = vector.broadcast %95 : vector<2x1x128xf32> to vector<2x4x128xf32>
    %114 = vector.broadcast %98 : vector<1x4x128xf32> to vector<2x4x128xf32>
    %115 = arith.mulf %113, %114 : vector<2x4x128xf32>
    %116 = arith.addf %112, %115 : vector<2x4x128xf32>
    %117 = arith.addf %89, %116 : vector<2x4x128xf32>
    %c0_12 = arith.constant 0 : index
    %c0_13 = arith.constant 0 : index
    %c0_14 = arith.constant 0 : index
    %118 = vector.load %arg5[%c0_12, %c0_13, %c0_14] : memref<2x4x128xf32, #tpu.memory_space<vmem>>, vector<2x4x128xf32>
    tpu.vector_store %arg5[%c0_12, %c0_13, %c0_14], %109 {strides = array<i32>} : memref<2x4x128xf32, #tpu.memory_space<vmem>>, vector<2x4x128xf32>,
    %c0_15 = arith.constant 0 : index
    %c0_16 = arith.constant 0 : index
    %c0_17 = arith.constant 0 : index
    %119 = vector.load %arg6[%c0_15, %c0_16, %c0_17] : memref<2x4x128xf32, #tpu.memory_space<vmem>>, vector<2x4x128xf32>
    tpu.vector_store %arg6[%c0_15, %c0_16, %c0_17], %117 {strides = array<i32>} : memref<2x4x128xf32, #tpu.memory_space<vmem>>, vector<2x4x128xf32>,
    return
  }
  func.func @transform_0(%arg0: i32) -> (i32, i32, i32) {
    %c0_i32 = arith.constant 0 : i32
    %c0_i32_0 = arith.constant 0 : i32
    %c0_i32_1 = arith.constant 0 : i32
    return %c0_i32, %c0_i32_0, %arg0 : i32, i32, i32
  }
  func.func @transform_1(%arg0: i32) -> (i32, i32, i32) {
    %c0_i32 = arith.constant 0 : i32
    %c0_i32_0 = arith.constant 0 : i32
    %c0_i32_1 = arith.constant 0 : i32
    return %c0_i32, %c0_i32_0, %arg0 : i32, i32, i32
  }
  func.func @transform_2(%arg0: i32) -> (i32, i32, i32) {
    %c0_i32 = arith.constant 0 : i32
    %c0_i32_0 = arith.constant 0 : i32
    %c0_i32_1 = arith.constant 0 : i32
    return %c0_i32, %c0_i32_0, %arg0 : i32, i32, i32
  }
  func.func @transform_3(%arg0: i32) -> (i32, i32, i32) {
    %c0_i32 = arith.constant 0 : i32
    %c0_i32_0 = arith.constant 0 : i32
    %c0_i32_1 = arith.constant 0 : i32
    return %c0_i32, %c0_i32_0, %arg0 : i32, i32, i32
  }
  func.func @transform_4(%arg0: i32) -> (i32, i32, i32) {
    %c0_i32 = arith.constant 0 : i32
    %c0_i32_0 = arith.constant 0 : i32
    %c0_i32_1 = arith.constant 0 : i32
    return %c0_i32, %c0_i32_0, %arg0 : i32, i32, i32
  }
  func.func @transform_5(%arg0: i32) -> (i32, i32, i32) {
    %c0_i32 = arith.constant 0 : i32
    %c0_i32_0 = arith.constant 0 : i32
    %c0_i32_1 = arith.constant 0 : i32
    return %c0_i32, %c0_i32_0, %arg0 : i32, i32, i32
  }
}

</mosaic_0001>

<bundles_post_ra>
// kernel: custom-call
= control target key start
LH: loop header
LB: loop body
LE: loop exit
PB: predicated region body
PF: predicated region fallthrough
CT: control target
= control target key end

     0   :  { %2 = vsyncpa [#allocation0], 0  ;;  %s47_s0 = inlined_call_operand.hbm [shape: c64[4,4,4,4], index: 0, kind: input, shape index: {}]   ;;  %s48_s1 = inlined_call_operand.vmem [shape: f32[4,4,4,4], index: 1, kind: output, shape index: {}]  }
   0x1   :  { %s3_s8 = sshll.u32 %s48_s1, 4  ;;  %s4_s8 = int_to_ptr.vmem [resolvable:$true] %s3_s8 }
   0x2   :  { %s17_s9 = scalar_lea.vmem %s4_s8, 1024  ;;  %p22_p1 = scmp.lt.s32.totalorder %s4_s8, %s4_s8 }
   0x3   :  { %p18_p0 = scmp.ne.s32.totalorder %s4_s8, %s17_s9  ;;  %p23_p2 = scmp.lt.s32.totalorder %s17_s9, %s17_s9 }
   0x5   :  { %p24_p3 = por %p23_p2, %p22_p1 }
   0x7   :  { %p25_p4 = pnand %p24_p3, %p18_p0 }
   0x9   :  { %28 = shalt.err (!%p25_p4)  }
   0xa   :  { %6 = dma.hbm_to_vmem [thread:$0]  %s47_s0, 1024, %s4_s8, [#allocation0] }
   0xb   :  { %29 = dma.done.wait [#allocation0], 1024  }
   0xc   :  { %30 = vsyncadd [#allocation0], 4294966272 }
   0xd   :  { %8 = vsyncpa [#allocation0], 1 }

// kernel: custom-call.1
= control target key start
LH: loop header
LB: loop body
LE: loop exit
PB: predicated region body
PF: predicated region fallthrough
CT: control target
= control target key end

     0   :  { %s51_s0 = inlined_call_operand.hbm [shape: c64[4,4,4,4], index: 0, kind: input, shape index: {}]   ;;  %s52_s1 = inlined_call_operand.vmem [shape: f32[4,4,4,4], index: 1, kind: output, shape index: {}]  }
   0x1   :  { %s2_s8 = scalar_lea.hbm %s51_s0, 1024 }
   0x2   :  { %3 = vsyncpa [#allocation0], 0  ;;  %s4_s11 = sshll.u32 %s52_s1, 4  ;;  %s5_s11 = int_to_ptr.vmem [resolvable:$true] %s4_s11 }
   0x3   :  { %s20_s12 = scalar_lea.vmem %s5_s11, 1024  ;;  %p25_p1 = scmp.lt.s32.totalorder %s5_s11, %s5_s11 }
   0x4   :  { %p21_p0 = scmp.ne.s32.totalorder %s5_s11, %s20_s12  ;;  %p26_p2 = scmp.lt.s32.totalorder %s20_s12, %s20_s12 }
   0x6   :  { %p27_p3 = por %p26_p2, %p25_p1 }
   0x8   :  { %p28_p4 = pnand %p27_p3, %p21_p0 }
   0xa   :  { %31 = shalt.err (!%p28_p4)  }
   0xb   :  { %7 = dma.hbm_to_vmem [thread:$0]  %s2_s8, 1024, %s5_s11, [#allocation0] }
   0xc   :  { %33 = dma.done.wait [#allocation0], 1024  }
   0xd   :  { %34 = vsyncadd [#allocation0], 4294966272 }
   0xe   :  { %9 = vsyncpa [#allocation0], 1 }

// kernel: reverse.0
= control target key start
LH: loop header
LB: loop body
LE: loop exit
PB: predicated region body
PF: predicated region fallthrough
CT: control target
= control target key end

     0   :  { %v72_v3 = vlaneseq  ;;  %v65_v9 = vld [vmem:[#allocation0 + $0x7] ss:$-1 sm:$0xff]  ;;  %v79_v12 = vld [vmem:[#allocation0 + $0x17] ss:$-1 sm:$0xff]  ;;  %s331_s0 = inlined_call_operand.vmem [shape: f32[2,4,16,7], index: 0, kind: input, shape index: {}]   ;;  %s332_s1 = inlined_call_operand.vmem [shape: f32[2,4,16,7], index: 1, kind: output, shape index: {}]  }
   0x1   :  { %v45_v0 = vld [vmem:[%s331_s0] sm:$0xff]  ;;  %v47_v1 = vld [vmem:[%s331_s0 + $0x8] sm:$0xff]  ;;  %v49_v2 = vld [vmem:[%s331_s0 + $0x10] sm:$0xff]  ;;  %v66_v10 = vrot.slane %v65_v9, 1  ;;  %v80_v14 = vrot.slane %v79_v12, 1 }
   0x2   :  { %46 = vst [vmem:[#allocation0 + $0x8] sm:$0xff] %v45_v0  ;;  %48 = vst [vmem:[#allocation0 + $0x18] sm:$0xff] %v47_v1  ;;  %v51_v4 = vld [vmem:[%s331_s0 + $0x18] sm:$0xff]  ;;  %v53_v5 = vld [vmem:[%s331_s0 + $0x20] sm:$0xff]  ;;  %v73_v11 = vshrl.u32 %v72_v3, 7 }
   0x3   :  { %50 = vst [vmem:[#allocation0 + $0x28] sm:$0xff] %v49_v2  ;;  %v55_v6 = vld [vmem:[%s331_s0 + $0x28] sm:$0xff]  ;;  %52 = vst [vmem:[#allocation0 + $0x38] sm:$0xff] %v51_v4  ;;  %v57_v7 = vld [vmem:[%s331_s0 + $0x30] sm:$0xff] }
   0x4   :  { %54 = vst [vmem:[#allocation0 + $0x48] sm:$0xff] %v53_v5  ;;  %56 = vst [vmem:[#allocation0 + $0x58] sm:$0xff] %v55_v6  ;;  %v59_v8 = vld [vmem:[%s331_s0 + $0x38] sm:$0xff]  ;;  %v93_v13 = vld [vmem:[#allocation0 + $0x27] ss:$-1 sm:$0xff]  ;;  %vm74_vm0 = vcmp.lt.s32.totalorder %v73_v11, 7 }
   0x5   :  { %58 = vst [vmem:[#allocation0 + $0x68] sm:$0xff] %v57_v7  ;;  %60 = vst [vmem:[#allocation0 + $0x78] sm:$0xff] %v59_v8  ;;  %v94_v15 = vrot.slane %v93_v13, 1  ;;  %v107_v16 = vld [vmem:[#allocation0 + $0x37] ss:$-1 sm:$0xff] }
   0x6   :  { %67 = vst [vmem:[#allocation1] sm:$0xff] %v66_v10  ;;  %v108_v17 = vrot.slane %v107_v16, 1  ;;  %v121_v18 = vld [vmem:[#allocation0 + $0x47] ss:$-1 sm:$0xff]  ;;  %v135_v19 = vld [vmem:[#allocation0 + $0x57] ss:$-1 sm:$0xff] }
   0x7   :  { %81 = vst [vmem:[#allocation1 + $0x8] sm:$0xff] %v80_v14  ;;  %95 = vst [vmem:[#allocation1 + $0x10] sm:$0xff] %v94_v15  ;;  %v122_v20 = vrot.slane %v121_v18, 1  ;;  %v136_v21 = vrot.slane %v135_v19, 1  ;;  %v149_v22 = vld [vmem:[#allocation0 + $0x67] ss:$-1 sm:$0xff] }
   0x8   :  { %v163_v23 = vld [vmem:[#allocation0 + $0x77] ss:$-1 sm:$0xff]  ;;  %109 = vst [vmem:[#allocation1 + $0x18] sm:$0xff] %v108_v17  ;;  %v150_v24 = vrot.slane %v149_v22, 1 }
   0x9   :  { %v164_v25 = vrot.slane %v163_v23, 1  ;;  %v70_v26 = vld [vmem:[#allocation0 + $0xf] ss:$-1 sm:$0xff]  ;;  %v84_v27 = vld [vmem:[#allocation0 + $0x1f] ss:$-1 sm:$0xff]  ;;  %123 = vst [vmem:[#allocation1 + $0x20] sm:$0xff] %v122_v20 }
   0xa   :  { %v98_v28 = vld [vmem:[#allocation0 + $0x2f] ss:$-1 sm:$0xff]  ;;  %137 = vst [vmem:[#allocation1 + $0x28] sm:$0xff] %v136_v21  ;;  %v71_v29 = vrot.slane %v70_v26, 1  ;;  %v85_v30 = vrot.slane %v84_v27, 1  ;;  %151 = vst [vmem:[#allocation1 + $0x30] sm:$0xff] %v150_v24 }
   0xb   :  { %v99_v31 = vrot.slane %v98_v28, 1  ;;  %v112_v32 = vld [vmem:[#allocation0 + $0x3f] ss:$-1 sm:$0xff]  ;;  %165 = vst [vmem:[#allocation1 + $0x38] sm:$0xff] %v164_v25  ;;  %v126_v34 = vld [vmem:[#allocation0 + $0x4f] ss:$-1 sm:$0xff] }
   0xc   :  { %v113_v33 = vrot.slane %v112_v32, 1  ;;  %v140_v35 = vld [vmem:[#allocation0 + $0x5f] ss:$-1 sm:$0xff]  ;;  %75 = vst.msk [vmem:[#allocation1] sm:$0xff] %vm74_vm0, %v71_v29  ;;  %89 = vst.msk [vmem:[#allocation1 + $0x8] sm:$0xff] %vm74_vm0, %v85_v30  ;;  %v127_v36 = vrot.slane %v126_v34, 1 }
   0xd   :  { %103 = vst.msk [vmem:[#allocation1 + $0x10] sm:$0xff] %vm74_vm0, %v99_v31  ;;  %v141_v37 = vrot.slane %v140_v35, 1  ;;  %v154_v38 = vld [vmem:[#allocation0 + $0x6f] ss:$-1 sm:$0xff]  ;;  %v168_v39 = vld [vmem:[#allocation0 + $0x7f] ss:$-1 sm:$0xff] }
   0xe   :  { %117 = vst.msk [vmem:[#allocation1 + $0x18] sm:$0xff] %vm74_vm0, %v113_v33  ;;  %v155_v40 = vrot.slane %v154_v38, 1  ;;  %v169_v41 = vrot.slane %v168_v39, 1  ;;  %131 = vst.msk [vmem:[#allocation1 + $0x20] sm:$0xff] %vm74_vm0, %v127_v36 }
   0xf   :  { %145 = vst.msk [vmem:[#allocation1 + $0x28] sm:$0xff] %vm74_vm0, %v141_v37 }
  0x10   :  { %159 = vst.msk [vmem:[#allocation1 + $0x30] sm:$0xff] %vm74_vm0, %v155_v40  ;;  %173 = vst.msk [vmem:[#allocation1 + $0x38] sm:$0xff] %vm74_vm0, %v169_v41 }
  0x13   :  { %v216_v42 = vld [vmem:[#allocation1] sm:$0xff]  ;;  %v218_v43 = vld [vmem:[#allocation1 + $0x8] sm:$0xff] }
  0x14   :  { %v220_v44 = vld [vmem:[#allocation1 + $0x10] sm:$0xff]  ;;  %217 = vst [vmem:[%s332_s1] sm:$0xff] %v216_v42  ;;  %219 = vst [vmem:[%s332_s1 + $0x8] sm:$0xff] %v218_v43 }
  0x15   :  { %221 = vst [vmem:[%s332_s1 + $0x10] sm:$0xff] %v220_v44  ;;  %v222_v45 = vld [vmem:[#allocation1 + $0x18] sm:$0xff]  ;;  %v224_v46 = vld [vmem:[#allocation1 + $0x20] sm:$0xff] }
  0x16   :  { %223 = vst [vmem:[%s332_s1 + $0x18] sm:$0xff] %v222_v45  ;;  %v226_v47 = vld [vmem:[#allocation1 + $0x28] sm:$0xff]  ;;  %225 = vst [vmem:[%s332_s1 + $0x20] sm:$0xff] %v224_v46 }
  0x17   :  { %227 = vst [vmem:[%s332_s1 + $0x28] sm:$0xff] %v226_v47  ;;  %v228_v48 = vld [vmem:[#allocation1 + $0x30] sm:$0xff]  ;;  %v230_v49 = vld [vmem:[#allocation1 + $0x38] sm:$0xff] }
  0x18   :  { %229 = vst [vmem:[%s332_s1 + $0x30] sm:$0xff] %v228_v48  ;;  %231 = vst [vmem:[%s332_s1 + $0x38] sm:$0xff] %v230_v49 }

// kernel: spectral_conv2d.1
= control target key start
LH: loop header
LB: loop body
LE: loop exit
PB: predicated region body
PF: predicated region fallthrough
CT: control target
= control target key end

     0   :  { %v31_v0 = vlaneseq  ;;  %s297_s0 = inlined_call_operand.vmem [shape: f32[2,4,128], index: 0, kind: input, shape index: {}]   ;;  %s298_s1 = inlined_call_operand.vmem [shape: f32[2,4,128], index: 1, kind: input, shape index: {}]   ;;  %s299_s2 = inlined_call_operand.vmem [shape: f32[4,4,128], index: 2, kind: input, shape index: {}]   ;;  %s300_s3 = inlined_call_operand.vmem [shape: f32[4,4,128], index: 3, kind: input, shape index: {}]   ;;  %s301_s4 = inlined_call_operand.vmem [shape: f32[2,4,128], index: 4, kind: output, shape index: {0}]   ;;  %s302_s5 = inlined_call_operand.vmem [shape: f32[2,4,128], index: 5, kind: output, shape index: {1}]  }
   0x1   :  { %v19_v2 = vld [vmem:[%s297_s0] sm:$0xf]  ;;  %v215_v5 = vld [vmem:[%s299_s2 + $0x4] sm:$0xf]  ;;  %v220_v10 = vld [vmem:[%s299_s2 + $0x8] sm:$0xf] }
   0x2   :  { %v32_v1 = vshrl.u32 %v31_v0, 7  ;;  %v21_v3 = vld [vmem:[%s298_s1] sm:$0xf]  ;;  %v230_v12 = vld [vmem:[%s300_s3 + $0x4] sm:$0xf] }
   0x3   :  { %v210_v4 = vld [vmem:[%s299_s2] sm:$0xf]  ;;  %v235_v13 = vld [vmem:[%s299_s2 + $0xc] sm:$0xf]  ;;  %v240_v14 = vld [vmem:[%s300_s3 + $0x8] sm:$0xf] }
   0x4   :  { %v33_v6 = vsub.s32 0, %v32_v1  ;;  %v65_v7 = vsub.s32 1, %v32_v1  ;;  %v97_v8 = vsub.s32 2, %v32_v1  ;;  %v129_v9 = vsub.s32 3, %v32_v1  ;;  %v225_v11 = vld [vmem:[%s300_s3] sm:$0xf] }
   0x5   :  { %v245_v15 = vld [vmem:[%s300_s3 + $0xc] sm:$0xf]  ;;  %v20_v24 = vld [vmem:[%s297_s0 + $0x4] sm:$0xf] }
   0x6   :  { %v34_v16 = vrot.slane %v19_v2, %v33_v6  ;;  %v44_v17 = vrot.slane %v21_v3, %v33_v6  ;;  %v66_v18 = vrot.slane %v19_v2, %v65_v7  ;;  %v76_v19 = vrot.slane %v21_v3, %v65_v7  ;;  %v22_v25 = vld [vmem:[%s298_s1 + $0x4] sm:$0xf] }
   0x7   :  { %v98_v20 = vrot.slane %v19_v2, %v97_v8  ;;  %v108_v21 = vrot.slane %v21_v3, %v97_v8  ;;  %v130_v22 = vrot.slane %v19_v2, %v129_v9  ;;  %v140_v23 = vrot.slane %v21_v3, %v129_v9 }
   0x8   :  { %v39_v26 = vmul.f32 %v34_v16, %v210_v4  ;;  %v49_v27 = vmul.f32 %v44_v17, %v225_v11  ;;  %v71_v28 = vmul.f32 %v66_v18, %v215_v5  ;;  %v81_v29 = vmul.f32 %v76_v19, %v230_v12 }
   0x9   :  { %v103_v30 = vmul.f32 %v98_v20, %v220_v10  ;;  %v113_v31 = vmul.f32 %v108_v21, %v240_v14  ;;  %v135_v32 = vmul.f32 %v130_v22, %v235_v13  ;;  %v145_v33 = vmul.f32 %v140_v23, %v245_v15 }
   0xa   :  { %v51_v34 = vsub.f32 %v39_v26, %v49_v27  ;;  %v83_v35 = vsub.f32 %v71_v28, %v81_v29  ;;  %v38_v36 = vrot.slane %v20_v24, %v33_v6  ;;  %v48_v37 = vrot.slane %v22_v25, %v33_v6 }
   0xb   :  { %v115_v38 = vsub.f32 %v103_v30, %v113_v31  ;;  %v147_v39 = vsub.f32 %v135_v32, %v145_v33  ;;  %v70_v40 = vrot.slane %v20_v24, %v65_v7  ;;  %v80_v41 = vrot.slane %v22_v25, %v65_v7 }
   0xc   :  { %v85_v42 = vadd.f32 %v83_v35, %v51_v34  ;;  %v40_v43 = vmul.f32 %v38_v36, %v210_v4  ;;  %v50_v44 = vmul.f32 %v48_v37, %v225_v11  ;;  %v102_v45 = vrot.slane %v20_v24, %v97_v8 }
   0xd   :  { %v72_v46 = vmul.f32 %v70_v40, %v215_v5  ;;  %v82_v47 = vmul.f32 %v80_v41, %v230_v12  ;;  %v112_v48 = vrot.slane %v22_v25, %v97_v8  ;;  %v134_v49 = vrot.slane %v20_v24, %v129_v9 }
   0xe   :  { %v117_v50 = vadd.f32 %v115_v38, %v85_v42  ;;  %v52_v51 = vsub.f32 %v40_v43, %v50_v44  ;;  %v104_v52 = vmul.f32 %v102_v45, %v220_v10  ;;  %v144_v53 = vrot.slane %v22_v25, %v129_v9 }
   0xf   :  { %v84_v54 = vsub.f32 %v72_v46, %v82_v47  ;;  %v114_v55 = vmul.f32 %v112_v48, %v240_v14  ;;  %v136_v56 = vmul.f32 %v134_v49, %v235_v13  ;;  %v55_v57 = vmul.f32 %v34_v16, %v225_v11 }
  0x10   :  { %v149_v58 = vadd.f32 %v147_v39, %v117_v50  ;;  %v146_v59 = vmul.f32 %v144_v53, %v245_v15  ;;  %v57_v60 = vmul.f32 %v44_v17, %v210_v4  ;;  %v87_v61 = vmul.f32 %v66_v18, %v230_v12 }
  0x11   :  { %v86_v62 = vadd.f32 %v84_v54, %v52_v51  ;;  %v116_v63 = vsub.f32 %v104_v52, %v114_v55  ;;  %v89_v0 = vmul.f32 %v76_v19, %v215_v5  ;;  %v119_v1 = vmul.f32 %v98_v20, %v240_v14 }
  0x12   :  { %159 = vst [vmem:[%s301_s4] sm:$0xf] %v149_v58  ;;  %v148_v2 = vsub.f32 %v136_v56, %v146_v59  ;;  %v59_v3 = vadd.f32 %v57_v60, %v55_v57  ;;  %v121_v6 = vmul.f32 %v108_v21, %v220_v10  ;;  %v151_v7 = vmul.f32 %v130_v22, %v245_v15 }
  0x13   :  { %v118_v8 = vadd.f32 %v116_v63, %v86_v62  ;;  %v91_v9 = vadd.f32 %v89_v0, %v87_v61  ;;  %v153_v16 = vmul.f32 %v140_v23, %v235_v13  ;;  %v56_v17 = vmul.f32 %v38_v36, %v225_v11 }
  0x14   :  { %v123_v18 = vadd.f32 %v121_v6, %v119_v1  ;;  %v58_v19 = vmul.f32 %v48_v37, %v210_v4  ;;  %v88_v20 = vmul.f32 %v70_v40, %v230_v12  ;;  %v90_v24 = vmul.f32 %v80_v41, %v215_v5 }
  0x15   :  { %v150_v25 = vadd.f32 %v148_v2, %v118_v8  ;;  %v93_v26 = vadd.f32 %v91_v9, %v59_v3  ;;  %v155_v27 = vadd.f32 %v153_v16, %v151_v7  ;;  %v120_v21 = vmul.f32 %v102_v45, %v240_v14 }
  0x16   :  { %v60_v28 = vadd.f32 %v58_v19, %v56_v17  ;;  %v92_v22 = vadd.f32 %v90_v24, %v88_v20  ;;  %v122_v29 = vmul.f32 %v112_v48, %v220_v10  ;;  %v152_v23 = vmul.f32 %v134_v49, %v245_v15 }
  0x17   :  { %160 = vst [vmem:[%s301_s4 + $0x4] sm:$0xf] %v150_v25  ;;  %v125_v4 = vadd.f32 %v123_v18, %v93_v26  ;;  %v154_v11 = vmul.f32 %v144_v53, %v235_v13 }
  0x18   :  { %v94_v12 = vadd.f32 %v92_v22, %v60_v28  ;;  %v124_v5 = vadd.f32 %v122_v29, %v120_v21 }
  0x19   :  { %v157_v30 = vadd.f32 %v155_v27, %v125_v4  ;;  %v156_v31 = vadd.f32 %v154_v11, %v152_v23 }
  0x1a   :  { %v126_v32 = vadd.f32 %v124_v5, %v94_v12 }
  0x1b   :  { %161 = vst [vmem:[%s302_s5] sm:$0xf] %v157_v30 }
  0x1c   :  { %v158_v14 = vadd.f32 %v156_v31, %v126_v32 }
  0x1e   :  { %162 = vst [vmem:[%s302_s5 + $0x4] sm:$0xf] %v158_v14 }

</bundles_post_ra>
